<compile_context>
chip_gen: v5e
topology: v5e:2x2
jax: 0.10.0
libtpu: 0.0.40
codegen_flags: <defaults>
</compile_context>

<pallas_src>
import functools

import jax
import jax.numpy as jnp
from jax.experimental import pallas as pl
from jax.experimental.pallas import tpu as pltpu


def _round_up(x: int, m: int) -> int:
    return ((x + m - 1) // m) * m


def discriminator_kernel(x_ref, w1t_ref, b1_ref, w2t_ref, b2_ref, o_ref):
    # x_ref : [TB, n_z]  natural layout straight from HBM (contiguous DMA)
    # o_ref : [1, TB]    lane-dense output row (batch on the 128-lane axis)
    x = x_ref[...]                 # [TB, n_z]
    w1t = w1t_ref[...]             # [32, n_z]
    b1 = b1_ref[...]               # [32, 1]  (broadcasts across lanes)
    w2t = w2t_ref[...]             # [1, 32]
    b2 = b2_ref[0, 0]              # scalar bias from SMEM

    # Layer 1 (MXU): [32, n_z] @ [n_z, TB] -> [32, TB].  The small [TB, n_z]
    # -> [n_z, TB] relayout is done in-kernel (XLU slot, idle under an
    # HBM-bound regime); batch lands on the lane axis for everything after.
    h = jnp.dot(w1t, x.T, preferred_element_type=jnp.float32) + b1
    # LeakyReLU (PyTorch default negative_slope = 0.01) on the VPU.
    h = jnp.where(h >= 0.0, h, 0.01 * h)
    # Dropout(p=0.2): identity in eval-mode forward.
    # TODO(synk): training-mode dropout would need pltpu.prng_* mask + 1/(1-p) scaling.
    # Layer 2 (MXU): [1, 32] @ [32, TB] -> [1, TB] (lane-dense output row).
    y = jnp.dot(w2t, h, preferred_element_type=jnp.float32) + b2
    # Sigmoid: exp on the EUP; exact reciprocal kept for f32 parity with torch.
    o_ref[...] = pl.reciprocal(1.0 + jnp.exp(-y), approx=False)


@functools.partial(jax.jit, static_argnames=("block_b", "core_parallel"))
def discriminator_forward(x, w1, b1, w2, b2, *, block_b=16384, core_parallel=False):
    """x: [B, n_z] f32; w1: [n_z, 32]; b1: [32]; w2: [32, 1]; b2: [] -> [B, 1]."""
    B, n_z = x.shape
    hidden = w1.shape[1]

    # Lane-aligned batch tile, as large as block_b allows (grid-step overhead
    # is the binding cost for this memory-bound kernel).  Ragged tail handled
    # by the grid itself — no padding of x, no post-kernel slice.
    tb = _round_up(min(block_b, _round_up(B, 128)), 128)
    grid = (pl.cdiv(B, tb),)

    # Tiny one-time parameter plumbing (a few KB, negligible).
    w1t = w1.T                      # [32, n_z]
    b1c = b1.reshape(hidden, 1)     # [32, 1]
    w2t = w2.T                      # [1, 32]
    b2s = b2.reshape(1, 1)          # [1, 1] scalar -> SMEM

    batch_sem = pltpu.CORE_PARALLEL if core_parallel else "parallel"

    out_row = pl.pallas_call(
        discriminator_kernel,
        out_shape=jax.ShapeDtypeStruct((1, B), jnp.float32),
        grid=grid,
        in_specs=[
            pl.BlockSpec((tb, n_z), lambda i: (i, 0)),          # x tile (contiguous, pipelined)
            pl.BlockSpec((hidden, n_z), lambda i: (0, 0)),      # W1^T (VMEM-resident)
            pl.BlockSpec((hidden, 1), lambda i: (0, 0)),        # b1   (VMEM-resident)
            pl.BlockSpec((1, hidden), lambda i: (0, 0)),        # W2^T (VMEM-resident)
            pl.BlockSpec(memory_space=pltpu.MemorySpace.SMEM),  # b2 scalar
        ],
        out_specs=pl.BlockSpec((1, tb), lambda i: (0, i)),      # lane-dense output row
        compiler_params=pltpu.CompilerParams(
            dimension_semantics=(batch_sem,),
        ),
    )(x, w1t, b1c, w2t, b2s)

    # Only remaining post-kernel op: metadata reshape (1, B) -> (B, 1) to match
    # the nn.Module output shape.  Callers that can consume the row directly
    # should take `out_row` as-is.
    return out_row.reshape(B, 1)


def init_params(key, n_z, hidden=32):
    """Deterministic init matching PyTorch nn.Linear default:
    U(-1/sqrt(fan_in), 1/sqrt(fan_in)) for both weight and bias."""
    k1, k2, k3, k4 = jax.random.split(key, 4)
    bound1 = 1.0 / jnp.sqrt(jnp.float32(n_z))
    bound2 = 1.0 / jnp.sqrt(jnp.float32(hidden))
    # Stored as [in, out] so the reference math is x @ W + b.
    w1 = jax.random.uniform(k1, (n_z, hidden), jnp.float32, -bound1, bound1)
    b1 = jax.random.uniform(k2, (hidden,), jnp.float32, -bound1, bound1)
    w2 = jax.random.uniform(k3, (hidden, 1), jnp.float32, -bound2, bound2)
    b2 = jax.random.uniform(k4, (), jnp.float32, -bound2, bound2)
    return w1, b1, w2, b2


if __name__ == "__main__":
    # args = {'dim_h': 128, 'n_z': 8}  (dim_h is unused in the forward pass)
    n_z = 8
    hidden = 32
    batch = 200          # not a multiple of 128: exercises the ragged-tail grid

    key = jax.random.PRNGKey(0)
    kx, kp = jax.random.split(key)
    x = jax.random.normal(kx, (batch, n_z), jnp.float32)
    w1, b1, w2, b2 = init_params(kp, n_z, hidden)

    # Reference in plain JAX (same math, eval-mode dropout = identity).
    h_ref = x @ w1 + b1
    h_ref = jnp.where(h_ref >= 0.0, h_ref, 0.01 * h_ref)
    y_ref = 1.0 / (1.0 + jnp.exp(-(h_ref @ w2 + b2)))

    # 1) Small tile -> multi-step grid with a ragged last tile (masking path).
    out_small = discriminator_forward(x, w1, b1, w2, b2, block_b=128)
    out_small = jax.block_until_ready(out_small)
    # 2) Default large tile -> single-step grid (the production configuration).
    out_big = discriminator_forward(x, w1, b1, w2, b2)
    out_big = jax.block_until_ready(out_big)

    assert out_small.shape == (batch, 1)
    assert out_big.shape == (batch, 1)
    assert jnp.allclose(out_small, y_ref, atol=1e-5, rtol=1e-5)
    assert jnp.allclose(out_big, y_ref, atol=1e-5, rtol=1e-5)

    print("KERNEL_OK")
</pallas_src>

<mosaic_0001>
module attributes {stable_mosaic.version = 11 : i64} {
  func.func @discriminator_kernel(%arg0: i32, %arg1: memref<128x8xf32, #tpu.memory_space<vmem>>, %arg2: memref<32x8xf32, #tpu.memory_space<vmem>>, %arg3: memref<32x1xf32, #tpu.memory_space<vmem>>, %arg4: memref<1x32xf32, #tpu.memory_space<vmem>>, %arg5: memref<1x1xf32, #tpu.memory_space<smem>>, %arg6: memref<1x128xf32, #tpu.memory_space<vmem>>) attributes {dimension_semantics = [#tpu.dimension_semantics<parallel>], iteration_bounds = array<i64: 2>, scalar_prefetch = 0 : i64, scratch_operands = 0 : i64, tpu.core_type = #tpu.core_type<tc>, window_params = [{transform_indices = @transform_0, window_bounds = array<i64: 128, 8>}, {pipeline_mode = #tpu.pipeline_mode<synchronous>, transform_indices = @transform_1, window_bounds = array<i64: 32, 8>}, {pipeline_mode = #tpu.pipeline_mode<synchronous>, transform_indices = @transform_2, window_bounds = array<i64: 32, 1>}, {pipeline_mode = #tpu.pipeline_mode<synchronous>, transform_indices = @transform_3, window_bounds = array<i64: 1, 32>}, {transform_indices = @transform_4, window_bounds = array<i64: 1, 1>}, {transform_indices = @transform_5, window_bounds = array<i64: 1, 128>}]} {
    %c0 = arith.constant 0 : index
    %c0_0 = arith.constant 0 : index
    %0 = vector.load %arg1[%c0, %c0_0] : memref<128x8xf32, #tpu.memory_space<vmem>>, vector<128x8xf32>
    %c0_1 = arith.constant 0 : index
    %c0_2 = arith.constant 0 : index
    %1 = vector.load %arg2[%c0_1, %c0_2] : memref<32x8xf32, #tpu.memory_space<vmem>>, vector<32x8xf32>
    %c0_3 = arith.constant 0 : index
    %c0_4 = arith.constant 0 : index
    %2 = vector.load %arg3[%c0_3, %c0_4] : memref<32x1xf32, #tpu.memory_space<vmem>>, vector<32x1xf32>
    %c0_5 = arith.constant 0 : index
    %c0_6 = arith.constant 0 : index
    %3 = vector.load %arg4[%c0_5, %c0_6] : memref<1x32xf32, #tpu.memory_space<vmem>>, vector<1x32xf32>
    %c0_7 = arith.constant 0 : index
    %c0_8 = arith.constant 0 : index
    %4 = memref.load %arg5[%c0_7, %c0_8] : memref<1x1xf32, #tpu.memory_space<smem>>
    %5 = tpu.transpose %0, [1, 0] : vector<128x8xf32> -> vector<8x128xf32>
    %cst = arith.constant dense<0.000000e+00> : vector<32x128xf32>
    %6 = tpu.matmul %1, %5, %cst {dimension_numbers = #tpu.dot_dimension_numbers<[1], [0], [0], [1], [0, 0, 1, 1], [], []>} : vector<32x8xf32>, vector<8x128xf32>, vector<32x128xf32> -> vector<32x128xf32>
    %7 = vector.broadcast %2 : vector<32x1xf32> to vector<32x128xf32>
    %8 = arith.addf %6, %7 : vector<32x128xf32>
    %cst_9 = arith.constant 0.000000e+00 : f32
    %9 = vector.broadcast %cst_9 : f32 to vector<32x128xf32>
    %10 = arith.cmpf oge, %8, %9 : vector<32x128xf32>
    %cst_10 = arith.constant 0.00999999977 : f32
    %11 = vector.broadcast %cst_10 : f32 to vector<32x128xf32>
    %12 = arith.mulf %11, %8 : vector<32x128xf32>
    %13 = arith.select %10, %8, %12 : vector<32x128xi1>, vector<32x128xf32>
    %cst_11 = arith.constant dense<0.000000e+00> : vector<1x128xf32>
    %14 = tpu.matmul %3, %13, %cst_11 {dimension_numbers = #tpu.dot_dimension_numbers<[1], [0], [0], [1], [0, 0, 1, 1], [], []>} : vector<1x32xf32>, vector<32x128xf32>, vector<1x128xf32> -> vector<1x128xf32>
    %15 = vector.broadcast %4 : f32 to vector<1x128xf32>
    %16 = arith.addf %14, %15 : vector<1x128xf32>
    %cst_12 = arith.constant 0.000000e+00 : f32
    %17 = vector.broadcast %cst_12 : f32 to vector<1x128xf32>
    %18 = arith.subf %17, %16 : vector<1x128xf32>
    %19 = math.exp %18 : vector<1x128xf32>
    %cst_13 = arith.constant 1.000000e+00 : f32
    %20 = vector.broadcast %cst_13 : f32 to vector<1x128xf32>
    %21 = arith.addf %20, %19 : vector<1x128xf32>
    %22 = tpu.reciprocal %21 : vector<1x128xf32> -> vector<1x128xf32>
    %c0_14 = arith.constant 0 : index
    %c0_15 = arith.constant 0 : index
    %23 = vector.load %arg6[%c0_14, %c0_15] : memref<1x128xf32, #tpu.memory_space<vmem>>, vector<1x128xf32>
    tpu.vector_store %arg6[%c0_14, %c0_15], %22 {strides = array<i32>} : memref<1x128xf32, #tpu.memory_space<vmem>>, vector<1x128xf32>,
    return
  }
  func.func @transform_0(%arg0: i32) -> (i32, i32) {
    %c0_i32 = arith.constant 0 : i32
    %c0_i32_0 = arith.constant 0 : i32
    return %arg0, %c0_i32 : i32, i32
  }
  func.func @transform_1(%arg0: i32) -> (i32, i32) {
    %c0_i32 = arith.constant 0 : i32
    %c0_i32_0 = arith.constant 0 : i32
    %c0_i32_1 = arith.constant 0 : i32
    return %c0_i32, %c0_i32_0 : i32, i32
  }
  func.func @transform_2(%arg0: i32) -> (i32, i32) {
    %c0_i32 = arith.constant 0 : i32
    %c0_i32_0 = arith.constant 0 : i32
    %c0_i32_1 = arith.constant 0 : i32
    return %c0_i32, %c0_i32_0 : i32, i32
  }
  func.func @transform_3(%arg0: i32) -> (i32, i32) {
    %c0_i32 = arith.constant 0 : i32
    %c0_i32_0 = arith.constant 0 : i32
    %c0_i32_1 = arith.constant 0 : i32
    return %c0_i32, %c0_i32_0 : i32, i32
  }
  func.func @transform_4(%arg0: i32) -> (i32, i32) {
    %c0_i32 = arith.constant 0 : i32
    %c0_i32_0 = arith.constant 0 : i32
    %c0_i32_1 = arith.constant 0 : i32
    return %c0_i32, %c0_i32_0 : i32, i32
  }
  func.func @transform_5(%arg0: i32) -> (i32, i32) {
    %c0_i32 = arith.constant 0 : i32
    %c0_i32_0 = arith.constant 0 : i32
    return %c0_i32, %arg0 : i32, i32
  }
}

</mosaic_0001>

<bundles_post_ra>
// kernel: discriminator_forward.1
= control target key start
LH: loop header
LB: loop body
LE: loop exit
PB: predicated region body
PF: predicated region fallthrough
CT: control target
= control target key end

     0   :  { %s891_s0 = inlined_call_operand.vmem [shape: f32[200,8], index: 0, kind: input, shape index: {}]   ;;  %s892_s1 = inlined_call_operand.vmem [shape: f32[32,8], index: 1, kind: input, shape index: {}]   ;;  %s893_s2 = inlined_call_operand.vmem [shape: f32[32,1], index: 2, kind: input, shape index: {}]   ;;  %s894_s3 = inlined_call_operand.vmem [shape: f32[1,32], index: 3, kind: input, shape index: {}]   ;;  %s895_s4 = inlined_call_operand.<no memory space> [shape: f32[1,1], index: 4, kind: input, shape index: {}]   ;;  %s896_s5 = inlined_call_operand.hbm [shape: f32[1,200], index: 5, kind: output, shape index: {}]  }
   0x1   :  { %10 = sst [smem:[#allocation2]] %s895_s4 }
   0x2   :  { %11 = vsyncpa [#allocation4], 0 }
   0x3   :  { %13 = vsyncpa [#allocation4 + $0x1], 0  ;;  %s710_s20 = smov 0   ;;  %s712_s21 = smov 0  }
   0x4   :  { %s714_s22 = smov 0   ;;  %s716_s23 = smov 0  }
   0x5 LB: > { %s731_s4 = sadd.s32 4294967295, %s674_s23   ;;  %s505_s24 = sadd.s32 4294967294, %s674_s23   ;;  %s674_s23 = sphi %s716_s23, %s902_s23   ;;  %s670_s22 = sphi %s714_s22, %s901_s22   ;;  %s666_s21 = sphi %s712_s21, %s900_s21   ;;  %s662_s20 = sphi %s710_s20, %s899_s20  }
   0x6   : > { %s735_s25 = sadd.s32 1, %s674_s23   ;;  %s136_s26 = sadd.s32 1, %s670_s22 }
   0x7   : > { %s133_s27 = ssub.s32 %s674_s23, %s735_s25  ;;  %p146_p0 = scmp.ne.s32.totalorder %s670_s22, %s666_s21 }
   0x8   : > { %p134_p1 = scmp.eq.s32.totalorder %s133_s27, 0  ;;  %p147_p2 = scmp.eq.s32.totalorder %s731_s4, 1 }
   0x9   : > { %p152_p3 = scmp.ne.s32.totalorder %s666_s21, %s662_s20  ;;  %p153_p4 = scmp.eq.s32.totalorder %s505_s24, 1 }
   0xa   : > { %s746_s28 = scalar_select %p134_p1, %s670_s22, %s136_s26  }
   0xb   : > { %p748_p5 = por %p147_p2, %p146_p0  ;;  %p752_p6 = por %p153_p4, %p152_p3 }
   0xc   : > { %p508_p7 = scmp.ge.s32.totalorder %s674_s23, 1  ;;  %p200_p8 = scmp.lt.s32.totalorder %s674_s23, 3 }
   0xe   : > { %p201_p9 = pnand %p508_p7, %p200_p8 }
   0xf   : > { %s509_s6 = sshll.u32 (!%p201_p9), %s731_s4, 4  ;;  %s270_s12 = sld [smem:[#allocation2]] (!%p201_p9) }
  0x10   : > { %204 = sbr.rel (%p201_p9) target bundleno = 401 (0x191), region = 40  ;;  %p236_p10 = scmp.lt.s32.totalorder (!%p201_p9), %s509_s6, 24 }
  0x11   : > { %s229_s13 = sand.u32 (!%p201_p9), 1, %s666_s21   ;;  %s446_s16 = scalar_lea.hbm (!%p201_p9), %s896_s5, %s731_s4 }
  0x12   : > { %s230_s17 = scalar_lea.vmem (!%p201_p9), [#allocation3], %s229_s13  ;;  %s450_s19 = sshll.u32 (!%p201_p9), %s446_s16, 4  ;;  %s451_s19 = int_to_ptr.hbm [resolvable:$true] %s450_s19 }
  0x13   : > { %s448_s18 = sshll.u32 (!%p201_p9), %s230_s17, 4  ;;  %s438_s24 = scalar_lea.sflag (!%p201_p9), [#allocation4], %s229_s13  ;;  %s449_s18 = int_to_ptr.vmem [resolvable:$true] %s448_s18 }
  0x14   : > { %s626_s4 = sshra.s32 (!%p201_p9), %s451_s19, 4  ;;  %s627_s4 = int_to_ptr.hbm [resolvable:$true] %s626_s4 }
  0x15   : > { %s904_s6 = smov (!%p236_p10, %s509_s6), 24  ;;  %vm291_vm0 = vcmask 64512   ;;  %v676_v10 = vmov 0   ;;  %v268_v12 = vld [vmem:[%s893_s2 + $0x18] sm:$0xff]  ;;  %v266_v13 = vld [vmem:[%s893_s2 + $0x8] sm:$0xff]  ;;  %v267_v16 = vld [vmem:[%s893_s2 + $0x10] sm:$0xff]  ;;  %v393_v46 = vstv %s270_s12  ;;  %p633_p0 = scmp.lt.s32.totalorder %s627_s4, %s896_s5 }
  0x16   : > { %s510_s7 = sshll.u32 %s904_s6, 3  ;;  %606 = vset.pattern.permute.xlu0 %v676_v10  ;;  %607 = vset.pattern.permute.xlu1 %v676_v10  ;;  %v265_v17 = vld [vmem:[%s893_s2] sm:$0xff]  ;;  %v263_v21 = vld [vmem:[%s892_s1 + $0x10] sm:$0xff]  ;;  %v262_v22 = vld [vmem:[%s892_s1 + $0x8] sm:$0xff]  ;;  %vm394_vm5 = vcmask 261120   ;;  %s628_s26 = scalar_lea.hbm %s627_s4, 1 }
  0x17   : > { %s762_s10 = scalar_lea.vmem %s891_s0, %s510_s7  ;;  %288 = vperm.xlu0 %606, %v268_v12   ;;  %278 = vperm.xlu1 %607, %v266_v13   ;;  %v261_v23 = vld [vmem:[%s892_s1] sm:$0xff]  ;;  %v264_v24 = vld [vmem:[%s892_s1 + $0x18] sm:$0xff]  ;;  %p629_p11 = scmp.ne.s32.totalorder %s627_s4, %s628_s26 }
  0x18   : > { %v260_v0 = vld [vmem:[%s762_s10 + $0x78] sm:$0xff]  ;;  %v259_v1 = vld [vmem:[%s762_s10 + $0x70] sm:$0xff]  ;;  %v258_v2 = vld [vmem:[%s762_s10 + $0x68] sm:$0xff]  ;;  %s632_s7 = scalar_lea.hbm %s896_s5, 2 }
  0x19   : > { %535 = vmatpush.xpose.msk.msra.mxu3 %vm291_vm0, %v260_v0  ;;  %534 = vmatpush.xpose.msk.msra.mxu2 %vm291_vm0, %v260_v0  ;;  %v257_v3 = vld [vmem:[%s762_s10 + $0x60] sm:$0xff]  ;;  %v256_v4 = vld [vmem:[%s762_s10 + $0x58] sm:$0xff]  ;;  %v255_v5 = vld [vmem:[%s762_s10 + $0x50] sm:$0xff]  ;;  %p630_p12 = pnand %p629_p11, %p748_p5  ;;  %p634_p1 = scmp.lt.s32.totalorder %s632_s7, %s628_s26 }
  0x1a   : > { %511 = vmatpush.xpose.msk.msra.mxu0 %vm291_vm0, %v260_v0  ;;  %v254_v6 = vld [vmem:[%s762_s10 + $0x48] sm:$0xff]  ;;  %v253_v7 = vld [vmem:[%s762_s10 + $0x40] sm:$0xff]  ;;  %v252_v8 = vld [vmem:[%s762_s10 + $0x38] sm:$0xff] }
  0x1b   : > { %v251_v9 = vld [vmem:[%s762_s10 + $0x30] sm:$0xff]  ;;  %v250_v11 = vld [vmem:[%s762_s10 + $0x28] sm:$0xff]  ;;  %v249_v14 = vld [vmem:[%s762_s10 + $0x20] sm:$0xff]  ;;  %p631_p13 = pneg %p630_p12  ;;  %p635_p2 = por %p634_p1, %p633_p0 }
  0x1c   : > { %v248_v15 = vld [vmem:[%s762_s10 + $0x18] sm:$0xff]  ;;  %v247_v18 = vld [vmem:[%s762_s10 + $0x10] sm:$0xff]  ;;  %v246_v19 = vld [vmem:[%s762_s10 + $0x8] sm:$0xff] }
  0x1d   : > { %537 = vmatpush.xpose.msk.msra.mxu3 %vm291_vm0, %v259_v1  ;;  %536 = vmatpush.xpose.msk.msra.mxu2 %vm291_vm0, %v259_v1  ;;  %v245_v20 = vld [vmem:[%s762_s10] sm:$0xff]  ;;  %p636_p3 = pnand %p635_p2, %p631_p13 }
  0x1e   : > { %512 = vmatpush.xpose.msk.msra.mxu0 %vm291_vm0, %v259_v1  ;;  %v269_v44 = vld [vmem:[%s894_s3] sm:$0x1] }
  0x1f   : > { %283 = vperm.xlu0 %606, %v267_v16   ;;  %273 = vperm.xlu1 %607, %v265_v17  }
  0x21   : > { %539 = vmatpush.xpose.msk.msra.mxu3 %vm291_vm0, %v258_v2  ;;  %538 = vmatpush.xpose.msk.msra.mxu2 %vm291_vm0, %v258_v2 }
  0x22   : > { %513 = vmatpush.xpose.msk.msra.mxu0 %vm291_vm0, %v258_v2 }
  0x25   : > { %541 = vmatpush.xpose.msk.msra.mxu3 %vm291_vm0, %v257_v3  ;;  %540 = vmatpush.xpose.msk.msra.mxu2 %vm291_vm0, %v257_v3 }
  0x26   : > { %514 = vmatpush.xpose.msk.msra.mxu0 %vm291_vm0, %v257_v3 }
  0x29   : > { %543 = vmatpush.xpose.msk.msra.mxu3 %vm291_vm0, %v256_v4  ;;  %542 = vmatpush.xpose.msk.msra.mxu2 %vm291_vm0, %v256_v4 }
  0x2a   : > { %515 = vmatpush.xpose.msk.msra.mxu0 %vm291_vm0, %v256_v4 }
  0x2d   : > { %545 = vmatpush.xpose.msk.msra.mxu3 %vm291_vm0, %v255_v5  ;;  %544 = vmatpush.xpose.msk.msra.mxu2 %vm291_vm0, %v255_v5 }
  0x2e   : > { %516 = vmatpush.xpose.msk.msra.mxu0 %vm291_vm0, %v255_v5 }
  0x31   : > { %547 = vmatpush.xpose.msk.msra.mxu3 %vm291_vm0, %v254_v6  ;;  %546 = vmatpush.xpose.msk.msra.mxu2 %vm291_vm0, %v254_v6 }
  0x32   : > { %517 = vmatpush.xpose.msk.msra.mxu0 %vm291_vm0, %v254_v6 }
  0x35   : > { %549 = vmatpush.xpose.msk.msra.mxu3 %vm291_vm0, %v253_v7  ;;  %548 = vmatpush.xpose.msk.msra.mxu2 %vm291_vm0, %v253_v7 }
  0x36   : > { %518 = vmatpush.xpose.msk.msra.mxu0 %vm291_vm0, %v253_v7 }
  0x39   : > { %551 = vmatpush.xpose.msk.msra.mxu3 %vm291_vm0, %v252_v8  ;;  %550 = vmatpush.xpose.msk.msra.mxu2 %vm291_vm0, %v252_v8 }
  0x3a   : > { %519 = vmatpush.xpose.msk.msra.mxu0 %vm291_vm0, %v252_v8 }
  0x3d   : > { %553 = vmatpush.xpose.msk.msra.mxu3 %vm291_vm0, %v251_v9  ;;  %552 = vmatpush.xpose.msk.msra.mxu2 %vm291_vm0, %v251_v9 }
  0x3e   : > { %520 = vmatpush.xpose.msk.msra.mxu0 %vm291_vm0, %v251_v9 }
  0x41   : > { %555 = vmatpush.xpose.msk.msra.mxu3 %vm291_vm0, %v250_v11  ;;  %554 = vmatpush.xpose.msk.msra.mxu2 %vm291_vm0, %v250_v11 }
  0x42   : > { %521 = vmatpush.xpose.msk.msra.mxu0 %vm291_vm0, %v250_v11 }
  0x45   : > { %557 = vmatpush.xpose.msk.msra.mxu3 %vm291_vm0, %v249_v14  ;;  %556 = vmatpush.xpose.msk.msra.mxu2 %vm291_vm0, %v249_v14 }
  0x46   : > { %522 = vmatpush.xpose.msk.msra.mxu0 %vm291_vm0, %v249_v14 }
  0x49   : > { %559 = vmatpush.xpose.msk.msra.mxu3 %vm291_vm0, %v248_v15  ;;  %558 = vmatpush.xpose.msk.msra.mxu2 %vm291_vm0, %v248_v15 }
  0x4a   : > { %523 = vmatpush.xpose.msk.msra.mxu0 %vm291_vm0, %v248_v15 }
  0x4d   : > { %561 = vmatpush.xpose.msk.msra.mxu3 %vm291_vm0, %v247_v18  ;;  %560 = vmatpush.xpose.msk.msra.mxu2 %vm291_vm0, %v247_v18 }
  0x4e   : > { %524 = vmatpush.xpose.msk.msra.mxu0 %vm291_vm0, %v247_v18 }
  0x51   : > { %563 = vmatpush.xpose.msk.msra.mxu3 %vm291_vm0, %v246_v19  ;;  %562 = vmatpush.xpose.msk.msra.mxu2 %vm291_vm0, %v246_v19 }
  0x52   : > { %525 = vmatpush.xpose.msk.msra.mxu0 %vm291_vm0, %v246_v19 }
  0x55   : > { %565 = vmatpush.xpose.msk.msra.mxu3 %vm291_vm0, %v245_v20  ;;  %564 = vmatpush.xpose.msk.msra.mxu2 %vm291_vm0, %v245_v20 }
  0x56   : > { %526 = vmatpush.xpose.msk.msra.mxu0 %vm291_vm0, %v245_v20 }
  0x58   : > { %529 = vmatmul.msk.f32.vlgmr.msra.gmra.mxu3 %vm291_vm0, %v263_v21  ;;  %528 = vmatmul.msk.f32.vlgmr.msra.gmra.mxu2 %vm291_vm0, %v262_v22 }
  0x59   : > { %527 = vmatmul.msk.f32.vlgmr.msra.gmra.mxu0 %vm291_vm0, %v261_v23 }
  0x60   : > { %530 = vmatmul.msk.f32.gmra.mxu3 %vm291_vm0, %v264_v24 }
  0x89   : > { %v289_v25 = vpop.permute.xlu0 %288  ;;  %v279_v26 = vpop.permute.xlu1 %278 }
  0x91   : > { %v284_v28 = vpop.permute.xlu0 %283  ;;  %v274_v31 = vpop.permute.xlu1 %273 }
  0xd6   : > { %v369_v32 = vpop.f32.mrf.mxu0 }
  0xd7   : > { %v370_v36 = vadd.f32 %v369_v32, %v274_v31 }
  0xd9   : > { %v385_v42 = vmul.f32 0.01, %v370_v36  ;;  %vm381_vm4 = vcmp.ge.f32.partialorder %v370_v36, 0.0 }
  0xdb   : > { %v375_v27 = vpop.f32.mrf.mxu3  ;;  %v372_v29 = vpop.f32.mrf.mxu2  ;;  %v389_v45 = vsel %vm381_vm4, %v370_v36, %v385_v42 }
  0xdc   : > { %v376_v30 = vadd.f32 %v375_v27, %v284_v28  ;;  %v373_v34 = vadd.f32 %v372_v29, %v279_v26 }
  0xde   : > { %v387_v38 = vmul.f32 0.01, %v376_v30  ;;  %vm383_vm2 = vcmp.ge.f32.partialorder %v376_v30, 0.0  ;;  %v386_v40 = vmul.f32 0.01, %v373_v34  ;;  %vm382_vm3 = vcmp.ge.f32.partialorder %v373_v34, 0.0 }
  0xe0   : > { %v391_v41 = vsel %vm383_vm2, %v376_v30, %v387_v38  ;;  %v390_v43 = vsel %vm382_vm3, %v373_v34, %v386_v40 }
  0xe3   : > { %v378_v33 = vpop.f32.mrf.mxu3 }
  0xe4   : > { %v379_v35 = vadd.f32 %v378_v33, %v289_v25 }
  0xe6   : > { %vm384_vm1 = vcmp.ge.f32.partialorder %v379_v35, 0.0  ;;  %v388_v37 = vmul.f32 0.01, %v379_v35 }
  0xe8   : > { %v392_v39 = vsel %vm384_vm1, %v379_v35, %v388_v37 }
  0xe9   : > { %410 = vmatpush.msra.mxu1 %v392_v39 }
  0xeb   : > { %411 = vmatpush.msra.mxu1 %v391_v41 }
  0xed   : > { %412 = vmatpush.msra.mxu1 %v390_v43 }
  0xef   : > { %413 = vmatpush.msra.mxu1 %v389_v45 }
  0xf0   : > { %531 = vmatmul.msk.f32.vlgmr.msra.gmra.mxu1 %vm394_vm5, %v269_v44 }
 0x16d   : > { %v415_v47 = vpop.f32.mrf.mxu1 }
 0x16e   : > { %v416_v48 = vadd.f32 %v415_v47, %v393_v46 }
 0x170   : > { %v418_v49 = vsub.f32 0.0, %v416_v48 }
 0x172   : > { %v419_v50 = vmul.f32 1.442695, %v418_v49 }
 0x174   : > { %608 = vpow2.f32 %v419_v50 }
 0x17a   : > { %v609_v51 = vpop.eup %608 }
 0x17b   : > { %v421_v52 = vadd.f32 1.0, %v609_v51 }
 0x17d   : > { %610 = vrcp.f32 %v421_v52  ;;  %v433_v56 = vand.u32 2147483648, %v421_v52  ;;  %v431_v58 = vand.u32 2147483647, %v421_v52  ;;  %vm427_vm7 = vweird.f32 %v421_v52 }
 0x17f   : > { %v434_v60 = vor.u32 1.1754944e-38, %v433_v56  ;;  %vm432_vm9 = vcmp.eq.f32.partialorder %v431_v58, 8.507059e+37 }
 0x183   : > { %v611_v53 = vpop.eup %610 }
 0x184   : > { %v423_v54 = vmul.f32 %v611_v53, %v421_v52  ;;  %vm428_vm6 = vweird.f32 %v611_v53 }
 0x185   : > { %vm429_vm8 = vmor %vm427_vm7, %vm428_vm6 }
 0x186   : > { %v424_v55 = vsub.f32 1.0, %v423_v54 }
 0x188   : > { %v425_v57 = vmul.f32 %v611_v53, %v424_v55 }
 0x18a   : > { %v426_v59 = vadd.f32 %v611_v53, %v425_v57 }
 0x18c   : > { %v430_v61 = vsel %vm429_vm8, %v611_v53, %v426_v59 }
 0x18d   : > { %v435_v62 = vsel %vm432_vm9, %v434_v60, %v430_v61 }
 0x18e   : > { %436 = vst [vmem:[%s230_s17] sm:$0x1] %v435_v62 }
 0x18f   : > { %639 = shalt.err (!%p636_p3)
}
 0x190   : > { %566 = dma.vmem_to_hbm [thread:$0]  (%p748_p5), %s449_s18, 16, %s451_s19, %s438_s24  }
 0x191 PF: > { %p572_p4 = scmp.ge.s32.totalorder %s674_s23, 2  ;;  %s462_s10 = sand.u32 1, %s662_s20  }
 0x192   : > { %s463_s11 = scalar_lea.sflag [#allocation4], %s462_s10 }
 0x193   : > { %p569_p7 = pnand %p572_p4, %p752_p6 }
 0x195   : > { %p570_p8 = pneg %p569_p7 }
 0x197   : > { %657 = dma.done.wait (%p570_p8), %s463_s11, 16  }
 0x198   : > { %659 = vsyncadd (%p570_p8), %s463_s11, 4294967280  ;;  %p16_p9 = scmp.ge.s32.totalorder %s735_s25, 4   ;;  %s899_s20 = smov %s666_s21 }
 0x199   : > { %s900_s21 = smov %s670_s22  ;;  %s901_s22 = smov %s746_s28 }
 0x19a   : > { %s902_s23 = smov %s735_s25  ;;  %18 = sbr.rel (!%p16_p9) target bundleno = 5 (0x5), region = 75 }
 0x19f   :  { %468 = vsyncpa [#allocation4], 1 }
 0x1a0   :  { %470 = vsyncpa [#allocation4 + $0x1], 1 }

</bundles_post_ra>
